<compile_context>
chip_gen: v7x
topology: tpu7x:2x2x1
jax: 0.10.0
libtpu: 0.0.40
codegen_flags: <defaults>
</compile_context>

<pallas_src>
import functools

import jax
import jax.numpy as jnp
from jax.experimental import pallas as pl
from jax.experimental.pallas import tpu as pltpu


_CLASS_CHUNK = 2048      # lane width of in-kernel f32 chunk temporaries (mult of 128)
_ROW_TILE_CAP = 4096     # max rows per grid step


def _round_up(x, m):
    return ((x + m - 1) // m) * m


def _vmem_limits():
    """Generation-aware (vmem_limit_bytes, tile_budget_bytes)."""
    phys = 64 * 1024 * 1024                      # conservative fallback == v7x per-TC VMEM
    try:
        info = pltpu.get_tpu_info()
        phys = int(getattr(info, "vmem_capacity_bytes", phys) or phys)
    except Exception:
        pass
    limit = min((phys * 3) // 4, 96 * 1024 * 1024)   # 96 MiB on v5e/v6e, 48 MiB on v7x
    budget = (limit * 2) // 3                        # headroom for layout slack / carries
    return limit, budget


def _class_chunk(n_classes):
    return min(_CLASS_CHUNK, _round_up(n_classes, 128))


def _choose_row_tile(n_rows, n_classes, itemsize, budget):
    """Largest sublane-aligned row tile that fits the VMEM budget."""
    ck = _class_chunk(n_classes)
    # 2x double-buffered native-dtype input rows + ~3 live f32 (TM, CK) chunk
    # temporaries + small (TM, 1) carries.
    bytes_per_row = n_classes * 2 * itemsize + ck * 12 + 64
    tm = min(budget // max(bytes_per_row, 1), _ROW_TILE_CAP)
    if tm >= n_rows:
        return int(n_rows)                       # single full-extent row block
    sub = max(8, 32 // itemsize)                 # rows per packed sublane group
    tm = max(sub, (tm // sub) * sub)
    # TODO(synk): for pathological C where even TM=sub overflows VMEM, add a
    # class-axis grid dimension with an online logsumexp accumulator.
    return int(tm)


def _per_row_terms(preds_ref, target):
    """Two-pass, class-chunked log-softmax statistics.

    preds_ref: (TM, C) VMEM block in its native dtype.  target: (TM, 1) int32.
    Returns (negsum, nll), each (TM, 1) float32:
        negsum = -sum_j log p_j = C * lse - sum_j (x_j - m)
        nll    = -log p_target  = lse - (x_target - m)
    Only (TM, CK) f32 temporaries are live at any point.
    """
    tm, n_classes = preds_ref.shape
    ck = _class_chunk(n_classes)
    n_full = n_classes // ck
    rem = n_classes - n_full * ck

    def load(start, width):
        if not isinstance(start, int):
            start = pl.multiple_of(start, 128)   # full chunks start at CK multiples
        return preds_ref[:, pl.ds(start, width)].astype(jnp.float32)

    # ---------- pass 1: per-row max ----------
    def max_chunk(start, width, m):
        return jnp.maximum(m, jnp.max(load(start, width), axis=-1, keepdims=True))

    m = jnp.full((tm, 1), -jnp.inf, dtype=jnp.float32)
    if n_full == 1:
        m = max_chunk(0, ck, m)
    elif n_full > 1:
        m = jax.lax.fori_loop(
            0, n_full, lambda i, acc: max_chunk(i * ck, ck, acc), m,
            unroll=n_full <= 8)
    if rem:
        m = max_chunk(n_full * ck, rem, m)

    # ---------- pass 2: exp-sum, sum(x - m), x[target] - m ----------
    def acc_chunk(start, width, carry):
        expsum, sumxm, xt = carry
        t = load(start, width) - m
        col = start + jax.lax.broadcasted_iota(jnp.int32, (tm, width), 1)
        expsum = expsum + jnp.sum(jnp.exp(t), axis=-1, keepdims=True)
        sumxm = sumxm + jnp.sum(t, axis=-1, keepdims=True)
        xt = xt + jnp.sum(jnp.where(col == target, t, 0.0), axis=-1, keepdims=True)
        return expsum, sumxm, xt

    zero = jnp.zeros((tm, 1), dtype=jnp.float32)
    carry = (zero, zero, zero)
    if n_full == 1:
        carry = acc_chunk(0, ck, carry)
    elif n_full > 1:
        carry = jax.lax.fori_loop(
            0, n_full, lambda i, c: acc_chunk(i * ck, ck, c), carry,
            unroll=n_full <= 8)
    if rem:
        carry = acc_chunk(n_full * ck, rem, carry)
    expsum, sumxm, xt = carry

    lse = jnp.log(expsum)
    negsum = jnp.float32(n_classes) * lse - sumxm
    nll = lse - xt
    return negsum, nll


def _reduce_kernel(n_rows, tm, steps_per_core, c_negsum, c_nll,
                   preds_ref, target_ref, out_ref):
    """Fused mean/sum path: per-core resident (1, 1) scalar accumulator."""
    core = pl.program_id(0)
    step = pl.program_id(1)

    @pl.when(step == 0)
    def _init():
        out_ref[...] = jnp.zeros_like(out_ref)

    negsum, nll = _per_row_terms(preds_ref, target_ref[...])
    fused = c_negsum * negsum + c_nll * nll

    # Mask rows past the end (partial last tile / duplicated clamped tile on
    # the second core when the tile count is odd).
    tile = core * steps_per_core + step
    row = tile * tm + jax.lax.broadcasted_iota(jnp.int32, fused.shape, 0)
    fused = jnp.where(row < n_rows, fused, 0.0)

    out_ref[...] += jnp.sum(fused, keepdims=True)


def _rows_kernel(c_negsum, c_nll, preds_ref, target_ref, out_ref):
    """reduction='none': fused per-row loss, (TM, 1) block."""
    negsum, nll = _per_row_terms(preds_ref, target_ref[...])
    out_ref[...] = c_negsum * negsum + c_nll * nll


def label_smoothing_loss(preds, target, smoothing=0.1, reduction="mean",
                         weight=None, _row_tile=None):
    """preds: (N, C) logits (any float dtype); target: (N,) integer labels."""
    assert 0 <= smoothing < 1
    # TODO(synk): optional per-class `weight` (as in F.nll_loss) is not implemented.
    assert weight is None

    n_rows, n_classes = preds.shape
    target2d = target.astype(jnp.int32).reshape(n_rows, 1)
    itemsize = preds.dtype.itemsize

    vmem_limit, vmem_budget = _vmem_limits()
    if _row_tile is None:
        tm = _choose_row_tile(n_rows, n_classes, itemsize, vmem_budget)
    else:
        tm = min(int(_row_tile), n_rows)
    n_tiles = pl.cdiv(n_rows, tm)

    # Static per-row coefficients: fuse smoothing*(loss/C) + (1-smoothing)*nll
    # (and the 1/N of reduction='mean') directly into the kernels.
    scale = 1.0 / n_rows if reduction == "mean" else 1.0
    c_negsum = float(smoothing) * scale / n_classes
    c_nll = (1.0 - float(smoothing)) * scale

    def preds_spec(index_map):
        block = (tm, n_classes)
        # Triple-buffer the input stream only when per-step blocks are small
        # and there are many steps (keeps HBM saturated, esp. on v7x).
        if tm < n_rows and n_tiles >= 8 and tm * n_classes * itemsize <= (8 << 20):
            return pl.BlockSpec(block, index_map, pipeline_mode=pl.Buffered(3))
        return pl.BlockSpec(block, index_map)

    if reduction in ("mean", "sum"):
        # Split row tiles across (up to) two TensorCores; each core accumulates
        # its own (1, 1) partial, summed in JAX afterwards.
        n_cores = 2 if n_tiles > 1 else 1
        steps = pl.cdiv(n_tiles, n_cores)
        last_tile = n_tiles - 1

        def in_map(core, step):
            # Clamp so the DMA stays in bounds; the duplicated tile is fully
            # masked inside the kernel via its logical (unclamped) tile index.
            return (jnp.minimum(core * steps + step, last_tile), 0)

        partials = pl.pallas_call(
            functools.partial(_reduce_kernel, n_rows, tm, steps, c_negsum, c_nll),
            grid=(n_cores, steps),
            in_specs=[preds_spec(in_map),
                      pl.BlockSpec((tm, 1), in_map)],
            out_specs=pl.BlockSpec((1, 1), lambda core, step: (core, 0)),
            out_shape=jax.ShapeDtypeStruct((n_cores, 1), jnp.float32),
            compiler_params=pltpu.CompilerParams(
                dimension_semantics=("parallel", "arbitrary"),
                vmem_limit_bytes=vmem_limit,
            ),
        )(preds, target2d)
        return jnp.sum(partials)

    # reduction == 'none': one fused per-row output.
    # TODO(synk): output keeps the (N, 1) sublane layout (masked lane-0 stores);
    # a lane-dense (1, N) layout would need an in-kernel (tm,1)->(1,tm) relayout
    # that does not lower portably for these degenerate shapes.
    out = pl.pallas_call(
        functools.partial(_rows_kernel, c_negsum, c_nll),
        grid=(n_tiles,),
        in_specs=[preds_spec(lambda i: (i, 0)),
                  pl.BlockSpec((tm, 1), lambda i: (i, 0))],
        out_specs=pl.BlockSpec((tm, 1), lambda i: (i, 0)),
        out_shape=jax.ShapeDtypeStruct((n_rows, 1), jnp.float32),
        compiler_params=pltpu.CompilerParams(
            dimension_semantics=("parallel",),
            vmem_limit_bytes=vmem_limit,
        ),
    )(preds, target2d)
    return out[:, 0]


def _reference(preds, target, smoothing=0.1, reduction="mean"):
    logp = jax.nn.log_softmax(preds.astype(jnp.float32), axis=-1)
    loss = -jnp.sum(logp, axis=-1)
    nll = -jnp.take_along_axis(logp, target[:, None], axis=-1)[:, 0]
    if reduction == "mean":
        loss, nll = jnp.mean(loss), jnp.mean(nll)
    elif reduction == "sum":
        loss, nll = jnp.sum(loss), jnp.sum(nll)
    n = preds.shape[-1]
    return smoothing * (loss / n) + (1.0 - smoothing) * nll


def _check(preds, target, smoothing, reduction, row_tile=None):
    out = jax.block_until_ready(
        label_smoothing_loss(preds, target, smoothing, reduction, _row_tile=row_tile))
    ref = _reference(preds, target, smoothing, reduction)
    assert jnp.allclose(out, ref, atol=1e-4, rtol=1e-4), (reduction, out, ref)


if __name__ == "__main__":
    key = jax.random.PRNGKey(0)
    k1, k2, k3, k4 = jax.random.split(key, 4)

    # Small case (single row tile, single class chunk).
    N, C = 8, 32
    preds = jax.random.normal(k1, (N, C), dtype=jnp.float32)
    target = jax.random.randint(k2, (N,), 0, C, dtype=jnp.int32)
    for red in ("mean", "sum", "none"):
        _check(preds, target, 0.1, red)

    # Larger case: multiple row tiles (odd count -> clamped tile on core 1),
    # partial last row tile, two class chunks + ragged remainder chunk.
    N2, C2 = 83, 4736
    preds2 = jax.random.normal(k3, (N2, C2), dtype=jnp.float32)
    target2 = jax.random.randint(k4, (N2,), 0, C2, dtype=jnp.int32)
    for red in ("mean", "sum", "none"):
        _check(preds2, target2, 0.1, red, row_tile=32)

    print("KERNEL_OK")
</pallas_src>

<mosaic_0001>
module attributes {stable_mosaic.version = 11 : i64} {
  func.func @_reduce_kernel(%arg0: i32, %arg1: i32, %arg2: memref<8x32xf32, #tpu.memory_space<vmem>>, %arg3: memref<8x1xi32, #tpu.memory_space<vmem>>, %arg4: memref<1x1xf32, #tpu.memory_space<vmem>>) attributes {dimension_semantics = [#tpu.dimension_semantics<parallel>, #tpu.dimension_semantics<arbitrary>], iteration_bounds = array<i64: 1, 1>, scalar_prefetch = 0 : i64, scratch_operands = 0 : i64, tpu.core_type = #tpu.core_type<tc>, window_params = [{transform_indices = @transform_0, window_bounds = array<i64: 8, 32>}, {transform_indices = @transform_1, window_bounds = array<i64: 8, 1>}, {transform_indices = @transform_2, window_bounds = array<i64: 1, 1>}]} {
    %c0_i32 = arith.constant 0 : i32
    %0 = arith.cmpi eq, %arg1, %c0_i32 : i32
    %1 = arith.extui %0 : i1 to i32
    %c0_i32_0 = arith.constant 0 : i32
    %2 = arith.cmpi ne, %1, %c0_i32_0 : i32
    scf.if %2 {
      %cst_23 = arith.constant 0.000000e+00 : f32
      %58 = vector.broadcast %cst_23 : f32 to vector<1x1xf32>
      %c0_24 = arith.constant 0 : index
      %c0_25 = arith.constant 0 : index
      %59 = vector.load %arg4[%c0_24, %c0_25] : memref<1x1xf32, #tpu.memory_space<vmem>>, vector<1x1xf32>
      tpu.vector_store %arg4[%c0_24, %c0_25], %58 {strides = array<i32>} : memref<1x1xf32, #tpu.memory_space<vmem>>, vector<1x1xf32>,
    } else {
    }
    %c0 = arith.constant 0 : index
    %c0_1 = arith.constant 0 : index
    %3 = vector.load %arg3[%c0, %c0_1] : memref<8x1xi32, #tpu.memory_space<vmem>>, vector<8x1xi32>
    %cst = arith.constant 0xFF800000 : f32
    %4 = vector.broadcast %cst : f32 to vector<8x1xf32>
    %c0_2 = arith.constant 0 : index
    %c0_3 = arith.constant 0 : index
    %5 = vector.load %arg2[%c0_2, %c0_3] : memref<8x32xf32, #tpu.memory_space<vmem>>, vector<8x32xf32>
    %cst_4 = arith.constant dense<0xFF800000> : vector<8xf32>
    %6 = vector.multi_reduction <maximumf>, %5, %cst_4 [1] : vector<8x32xf32> to vector<8xf32>
    %7 = vector.shape_cast %6 : vector<8xf32> to vector<8x1xf32>
    %8 = arith.maximumf %4, %7 : vector<8x1xf32>
    %cst_5 = arith.constant 0.000000e+00 : f32
    %9 = vector.broadcast %cst_5 : f32 to vector<8x1xf32>
    %c0_6 = arith.constant 0 : index
    %c0_7 = arith.constant 0 : index
    %10 = vector.load %arg2[%c0_6, %c0_7] : memref<8x32xf32, #tpu.memory_space<vmem>>, vector<8x32xf32>
    %11 = vector.broadcast %8 : vector<8x1xf32> to vector<8x32xf32>
    %12 = arith.subf %10, %11 : vector<8x32xf32>
    %13 = tpu.iota {dimensions = array<i32: 1>} : vector<8x32xi32>
    %c0_i32_8 = arith.constant 0 : i32
    %14 = vector.broadcast %c0_i32_8 : i32 to vector<8x32xi32>
    %15 = arith.addi %14, %13 : vector<8x32xi32>
    %16 = math.exp %12 : vector<8x32xf32>
    %cst_9 = arith.constant dense<0.000000e+00> : vector<8xf32>
    %17 = vector.multi_reduction <add>, %16, %cst_9 [1] : vector<8x32xf32> to vector<8xf32>
    %18 = vector.shape_cast %17 : vector<8xf32> to vector<8x1xf32>
    %19 = arith.addf %9, %18 : vector<8x1xf32>
    %cst_10 = arith.constant dense<0.000000e+00> : vector<8xf32>
    %20 = vector.multi_reduction <add>, %12, %cst_10 [1] : vector<8x32xf32> to vector<8xf32>
    %21 = vector.shape_cast %20 : vector<8xf32> to vector<8x1xf32>
    %22 = arith.addf %9, %21 : vector<8x1xf32>
    %23 = vector.broadcast %3 : vector<8x1xi32> to vector<8x32xi32>
    %24 = arith.cmpi eq, %15, %23 : vector<8x32xi32>
    %cst_11 = arith.constant 0.000000e+00 : f32
    %25 = vector.broadcast %cst_11 : f32 to vector<8x32xf32>
    %26 = arith.select %24, %12, %25 : vector<8x32xi1>, vector<8x32xf32>
    %cst_12 = arith.constant dense<0.000000e+00> : vector<8xf32>
    %27 = vector.multi_reduction <add>, %26, %cst_12 [1] : vector<8x32xf32> to vector<8xf32>
    %28 = vector.shape_cast %27 : vector<8xf32> to vector<8x1xf32>
    %29 = arith.addf %9, %28 : vector<8x1xf32>
    %30 = math.log %19 : vector<8x1xf32>
    %cst_13 = arith.constant 3.200000e+01 : f32
    %31 = vector.broadcast %cst_13 : f32 to vector<8x1xf32>
    %32 = arith.mulf %31, %30 : vector<8x1xf32>
    %33 = arith.subf %32, %22 : vector<8x1xf32>
    %34 = arith.subf %30, %29 : vector<8x1xf32>
    %cst_14 = arith.constant 3.906250e-04 : f32
    %35 = vector.broadcast %cst_14 : f32 to vector<8x1xf32>
    %36 = arith.mulf %35, %33 : vector<8x1xf32>
    %cst_15 = arith.constant 1.125000e-01 : f32
    %37 = vector.broadcast %cst_15 : f32 to vector<8x1xf32>
    %38 = arith.mulf %37, %34 : vector<8x1xf32>
    %39 = arith.addf %36, %38 : vector<8x1xf32>
    %c1_i32 = arith.constant 1 : i32
    %40 = arith.muli %arg0, %c1_i32 : i32
    %41 = arith.addi %40, %arg1 : i32
    %c8_i32 = arith.constant 8 : i32
    %42 = arith.muli %41, %c8_i32 : i32
    %43 = tpu.iota {dimensions = array<i32: 0>} : vector<8x1xi32>
    %44 = vector.broadcast %42 : i32 to vector<8x1xi32>
    %45 = arith.addi %44, %43 : vector<8x1xi32>
    %c8_i32_16 = arith.constant 8 : i32
    %46 = vector.broadcast %c8_i32_16 : i32 to vector<8x1xi32>
    %47 = arith.cmpi slt, %45, %46 : vector<8x1xi32>
    %cst_17 = arith.constant 0.000000e+00 : f32
    %48 = vector.broadcast %cst_17 : f32 to vector<8x1xf32>
    %49 = arith.select %47, %39, %48 : vector<8x1xi1>, vector<8x1xf32>
    %c0_18 = arith.constant 0 : index
    %c0_19 = arith.constant 0 : index
    %50 = vector.load %arg4[%c0_18, %c0_19] : memref<1x1xf32, #tpu.memory_space<vmem>>, vector<1x1xf32>
    %51 = vector.shape_cast %49 : vector<8x1xf32> to vector<1x8x1xf32>
    %cst_20 = arith.constant dense<0.000000e+00> : vector<1xf32>
    %52 = vector.multi_reduction <add>, %51, %cst_20 [1, 2] : vector<1x8x1xf32> to vector<1xf32>
    %53 = vector.shape_cast %52 : vector<1xf32> to vector<1x1x1xf32>
    %54 = vector.extract %53[0, 0, 0] : f32 from vector<1x1x1xf32>
    %55 = vector.broadcast %54 : f32 to vector<1x1xf32>
    %56 = arith.addf %50, %55 : vector<1x1xf32>
    %c0_21 = arith.constant 0 : index
    %c0_22 = arith.constant 0 : index
    %57 = vector.load %arg4[%c0_21, %c0_22] : memref<1x1xf32, #tpu.memory_space<vmem>>, vector<1x1xf32>
    tpu.vector_store %arg4[%c0_21, %c0_22], %56 {strides = array<i32>} : memref<1x1xf32, #tpu.memory_space<vmem>>, vector<1x1xf32>,
    return
  }
  func.func @transform_0(%arg0: i32, %arg1: i32) -> (i32, i32) {
    %c1_i32 = arith.constant 1 : i32
    %0 = arith.muli %arg0, %c1_i32 : i32
    %1 = arith.addi %0, %arg1 : i32
    %c0_i32 = arith.constant 0 : i32
    %2 = arith.minsi %1, %c0_i32 : i32
    %c0_i32_0 = arith.constant 0 : i32
    %c0_i32_1 = arith.constant 0 : i32
    return %2, %c0_i32_0 : i32, i32
  }
  func.func @transform_1(%arg0: i32, %arg1: i32) -> (i32, i32) {
    %c1_i32 = arith.constant 1 : i32
    %0 = arith.muli %arg0, %c1_i32 : i32
    %1 = arith.addi %0, %arg1 : i32
    %c0_i32 = arith.constant 0 : i32
    %2 = arith.minsi %1, %c0_i32 : i32
    %c0_i32_0 = arith.constant 0 : i32
    %c0_i32_1 = arith.constant 0 : i32
    return %2, %c0_i32_0 : i32, i32
  }
  func.func @transform_2(%arg0: i32, %arg1: i32) -> (i32, i32) {
    %c0_i32 = arith.constant 0 : i32
    %c0_i32_0 = arith.constant 0 : i32
    return %arg0, %c0_i32 : i32, i32
  }
}

</mosaic_0001>

<bundles_post_ra>
// kernel: tpu_custom_call.1
= control target key start
LH: loop header
LB: loop body
LE: loop exit
PB: predicated region body
PF: predicated region fallthrough
CT: control target
= control target key end

     0   :  { %vm74_vm0 = vcmask 261120   ;;  %s234_s0 = inlined_call_operand.vmem [shape: f32[8,32], index: 0, kind: input, shape index: {}]   ;;  %s235_s1 = inlined_call_operand.vmem [shape: s32[8,1], index: 1, kind: input, shape index: {}]   ;;  %s236_s2 = inlined_call_operand.hbm [shape: f32[1,1], index: 2, kind: output, shape index: {}]  }
   0x1   :  { %v73_v0 = vld [vmem:[%s234_s0] sm:$0xff] }
   0x2   :  { %7 = vsyncpa [#allocation3], 0  ;;  %v75_v1 = vsel %vm74_vm0, %v73_v0, -inf  ;;  %v192_v2 = vmov 0   ;;  %v72_v3 = vld [vmem:[%s235_s1] sm:$0xff]  ;;  %v79_v7 = vlaneseq  ;;  %vm117_vm2 = vcmask 7168  }
   0x3   :  { %163 = vset.pattern.permute.xlu0 %v192_v2  ;;  %vm70_vm3 = vcmask 0   ;;  %v193_v27 = vmov 0.0   ;;  %s194_s0 = smov [#allocation2]  }
   0x4   :  { %76 = vmax.xlane.f32.xlu0 %v75_v1  ;;  %v80_v8 = vand.u32 127, %v79_v7  ;;  %71 = vst.msk [vmem:[#allocation2] sm:$0x1] %vm70_vm3, %v193_v27  ;;  %s138_s1 = sshll.u32 %s194_s0, 4  ;;  %s139_s1 = int_to_ptr.vmem [resolvable:$true] %s138_s1 }
   0x5   :  { %s168_s14 = scalar_lea.vmem %s139_s1, 16  ;;  %s172_s15 = scalar_lea.vmem %s139_s1, 32 }
   0x6   :  { %p169_p0 = scmp.ne.s32.totalorder %s139_s1, %s168_s14  ;;  %p173_p1 = scmp.lt.s32.totalorder %s139_s1, %s139_s1 }
   0x7   :  { %p174_p2 = scmp.lt.s32.totalorder %s172_s15, %s168_s14 }
   0x9   :  { %p175_p3 = por %p174_p2, %p173_p1 }
   0xb   :  { %v116_v35 = vld [vmem:[#allocation2] sm:$0x1]  ;;  %p176_p4 = pnand %p175_p3, %p169_p0 }
  0x1a   :  { %92 = vperm.xlu0 %163, %v72_v3  }
  0x91   :  { %v77_v4 = vpop.xlane.xlu0 %76 }
  0x92   :  { %v78_v5 = vsub.f32 %v73_v0, %v77_v4 }
  0x94   :  { %v81_v6 = vmul.f32 1.442695, %v78_v5  ;;  %v87_v12 = vsel %vm74_vm0, %v78_v5, 0.0 }
  0x96   :  { %164 = vpow2.f32 %v81_v6 }
  0x99   :  { %v93_v10 = vpop.permute.xlu0 %92 }
  0x9a   :  { %vm94_vm1 = vcmp.eq.s32.totalorder %v80_v8, %v93_v10 }
  0x9b   :  { %v95_v13 = vsel %vm94_vm1, %v78_v5, 0.0 }
  0x9c   :  { %v96_v14 = vsel %vm74_vm0, %v95_v13, 0.0 }
  0xa0   :  { %v165_v9 = vpop.eup %164 }
  0xa1   :  { %v83_v11 = vsel %vm74_vm0, %v165_v9, 0.0 }
  0xa2   :  { %84 = vadd.xlane.f32.xlu1 %v83_v11 }
  0xa6   :  { %88 = vadd.xlane.f32.xlu1 %v87_v12 }
  0xaa   :  { %97 = vadd.xlane.f32.xlu1 %v96_v14 }
 0x12f   :  { %v85_v15 = vpop.xlane.xlu1 %84 }
 0x130   :  { %166 = vlog2.f32 %v85_v15 }
 0x133   :  { %v89_v16 = vpop.xlane.xlu1 %88 }
 0x137   :  { %v98_v19 = vpop.xlane.xlu1 %97 }
 0x13a   :  { %v167_v17 = vpop.eup %166 }
 0x13b   :  { %v101_v18 = vmul.f32 0.6931472, %v167_v17 }
 0x13d   :  { %v102_v20 = vmul.f32 32.0, %v101_v18  ;;  %v104_v21 = vsub.f32 %v101_v18, %v98_v19 }
 0x13f   :  { %v103_v22 = vsub.f32 %v102_v20, %v89_v16  ;;  %v106_v24 = vmul.f32 0.1125, %v104_v21 }
 0x141   :  { %v105_v23 = vmul.f32 0.000390625, %v103_v22 }
 0x143   :  { %v107_v25 = vadd.f32 %v106_v24, %v105_v23 }
 0x145   :  { %v118_v26 = vsel %vm117_vm2, %v107_v25, 0.0 }
 0x146   :  { %119 = vadd.xlane.f32.xlu1 %v118_v26 }
 0x1d3   :  { %v120_v28 = vpop.xlane.xlu1 %119 }
 0x1d4   :  { %v121_v29 = vrot.slane %v120_v28, 4 }
 0x1d6   :  { %v122_v30 = vadd.f32 %v121_v29, %v120_v28 }
 0x1d8   :  { %v123_v31 = vrot.slane %v122_v30, 2 }
 0x1da   :  { %v124_v32 = vadd.f32 %v123_v31, %v122_v30 }
 0x1dc   :  { %v125_v33 = vrot.slane %v124_v32, 1 }
 0x1de   :  { %v126_v34 = vadd.f32 %v125_v33, %v124_v32 }
 0x1e0   :  { %158 = vpush %v126_v34 }
 0x211   :  { %s159_s13 = spop %158 }
 0x212   :  { %v128_v36 = vstv %s159_s13 }
 0x213   :  { %v129_v37 = vadd.f32 %v128_v36, %v116_v35 }
 0x215   :  { %131 = vst.msk [vmem:[#allocation2] sm:$0x1] %vm70_vm3, %v129_v37 }
 0x216   :  { %179 = shalt.err (!%p176_p4)
}
 0x217   :  { %s180_s18 = scalar_lea.hbm %s236_s2, 16 }
 0x218   :  { %p181_p5 = scmp.ne.s32.totalorder %s236_s2, %s180_s18  ;;  %p184_p6 = scmp.lt.u32.totalorder %s180_s18, %s236_s2 }
 0x21a   :  { %p186_p7 = pnand %p184_p6, %p181_p5 }
 0x21c   :  { %189 = shalt.err (!%p186_p7)
}
 0x21d   :  { %141 = dma.vmem_to_hbm [thread:$0]  %s139_s1, 16, %s236_s2, [#allocation3]  }
 0x21e   :  { %190 = dma.done.wait [#allocation3], 16  }
 0x21f   :  { %191 = vsyncadd [#allocation3], 4294967280 }
 0x220   :  { %145 = vsyncpa [#allocation3], 1 }

</bundles_post_ra>
